<compile_context>
chip_gen: v6e
topology: v6e:2x2x1
jax: 0.10.0
libtpu: 0.0.40
codegen_flags: <defaults>
</compile_context>

<pallas_src>
import functools
import numpy as np
import jax
import jax.numpy as jnp
from jax import lax
from jax.experimental import pallas as pl
from jax.experimental.pallas import tpu as pltpu


# ------------------------------ Pallas kernel --------------------------------

def _conv3x3_prelu_kernel(x_ref, w_ref, mask_ref, b_ref, alpha_ref, o_ref,
                          *, H, W):
    # x_ref    : (1, C_in, N)       one batch item, N = H*W (lane dim)
    # w_ref    : (9, C_out, C_in)   tap t = ky*3+kx  ->  weight[:, :, ky, kx]
    # mask_ref : (9, 1, N)          f32 validity mask per tap (1 = in-image)
    # b_ref    : (C_out, 1)
    # alpha_ref: (1,) in SMEM       PReLU scalar
    # o_ref    : (1, C_out, N)
    C_out = o_ref.shape[1]
    N = H * W

    x = x_ref[0]                                                   # (C_in, N)

    acc = jnp.zeros((C_out, N), jnp.float32)
    for ky in range(3):
        for kx in range(3):
            t = ky * 3 + kx
            s = (ky - 1) * W + (kx - 1)
            if s == 0:
                # center tap: no shift, mask is all-ones -> skip both
                shifted = x
            else:
                # shifted[i] = x[(i + s) mod N]; wrapped / out-of-image
                # positions are zeroed by the precomputed tap mask.
                shifted = pltpu.roll(x, (-s) % N, 1) * mask_ref[t]
            acc = acc + jnp.dot(w_ref[t], shifted,
                                preferred_element_type=jnp.float32)

    acc = acc + b_ref[...]                                         # bias
    alpha = alpha_ref[0]
    out = jnp.where(acc >= 0, acc, alpha * acc)                    # PReLU
    o_ref[0] = out.astype(o_ref.dtype)


def _make_tap_masks(H, W):
    """f32 (9, 1, H*W) validity masks, one per 3x3 tap (numpy, trace-time)."""
    hh, ww = np.meshgrid(np.arange(H), np.arange(W), indexing="ij")
    hh = hh.reshape(-1)
    ww = ww.reshape(-1)
    masks = []
    for ky in range(3):
        for kx in range(3):
            dy, dx = ky - 1, kx - 1
            valid = ((hh + dy >= 0) & (hh + dy < H) &
                     (ww + dx >= 0) & (ww + dx < W))
            masks.append(valid.astype(np.float32))
    return np.stack(masks).reshape(9, 1, H * W)


def conv_block_forward(x, weight, bias, alpha):
    """ConvBlock.forward: Conv2d(C_in->C_out, 3x3, stride 1, pad 1) + PReLU."""
    B, C_in, H, W = x.shape
    C_out = weight.shape[0]
    N = H * W

    x_flat = x.reshape(B, C_in, N)                                 # free reshape
    w_taps = jnp.transpose(weight, (2, 3, 0, 1)).reshape(9, C_out, C_in)
    masks = jnp.asarray(_make_tap_masks(H, W))                     # (9, 1, N)
    b_col = bias.reshape(C_out, 1).astype(jnp.float32)
    alpha_arr = jnp.reshape(alpha, (1,)).astype(jnp.float32)

    kernel = functools.partial(_conv3x3_prelu_kernel, H=H, W=W)

    out = pl.pallas_call(
        kernel,
        out_shape=jax.ShapeDtypeStruct((B, C_out, N), jnp.float32),
        grid=(B,),
        in_specs=[
            pl.BlockSpec((1, C_in, N), lambda b: (b, 0, 0)),
            pl.BlockSpec((9, C_out, C_in), lambda b: (0, 0, 0)),
            pl.BlockSpec((9, 1, N), lambda b: (0, 0, 0)),
            pl.BlockSpec((C_out, 1), lambda b: (0, 0)),
            pl.BlockSpec(memory_space=pltpu.MemorySpace.SMEM),
        ],
        out_specs=pl.BlockSpec((1, C_out, N), lambda b: (b, 0, 0)),
        compiler_params=pltpu.CompilerParams(
            dimension_semantics=("parallel",)),
    )(x_flat, w_taps, masks, b_col, alpha_arr)

    return out.reshape(B, C_out, H, W)


# ----------------------------- pure-JAX reference ----------------------------

def ref_forward(x, weight, bias, alpha):
    out = lax.conv_general_dilated(
        x, weight, window_strides=(1, 1), padding=((1, 1), (1, 1)),
        dimension_numbers=("NCHW", "OIHW", "NCHW"))
    out = out + bias.reshape(1, -1, 1, 1)
    return jnp.where(out >= 0, out, alpha * out)


# ----------------------------------- main -------------------------------------

if __name__ == "__main__":
    key = jax.random.PRNGKey(0)
    k_x, k_w, k_b = jax.random.split(key, 3)

    B, C_in, C_out, H, W = 2, 4, 8, 16, 16

    x = jax.random.normal(k_x, (B, C_in, H, W), jnp.float32)
    weight = jax.random.normal(k_w, (C_out, C_in, 3, 3), jnp.float32) * 0.1
    bias = jax.random.normal(k_b, (C_out,), jnp.float32) * 0.1
    alpha = jnp.float32(0.5)          # torch.nn.PReLU(init=0.5), 1 parameter

    fwd = jax.jit(conv_block_forward)
    out = jax.block_until_ready(fwd(x, weight, bias, alpha))
    ref = jax.block_until_ready(ref_forward(x, weight, bias, alpha))

    assert out.shape == (B, C_out, H, W) and out.dtype == jnp.float32
    np.testing.assert_allclose(np.asarray(out), np.asarray(ref),
                               rtol=2e-2, atol=2e-2)

    print("KERNEL_OK")
</pallas_src>

<mosaic_0001>
module attributes {stable_mosaic.version = 11 : i64} {
  func.func @_conv3x3_prelu_kernel(%arg0: i32, %arg1: memref<1x4x256xf32, #tpu.memory_space<vmem>>, %arg2: memref<9x8x4xf32, #tpu.memory_space<vmem>>, %arg3: memref<9x1x256xf32, #tpu.memory_space<vmem>>, %arg4: memref<8x1xf32, #tpu.memory_space<vmem>>, %arg5: memref<1xf32, #tpu.memory_space<smem>>, %arg6: memref<1x8x256xf32, #tpu.memory_space<vmem>>) attributes {dimension_semantics = [#tpu.dimension_semantics<parallel>], iteration_bounds = array<i64: 2>, scalar_prefetch = 0 : i64, scratch_operands = 0 : i64, tpu.core_type = #tpu.core_type<tc>, window_params = [{transform_indices = @transform_0, window_bounds = array<i64: 1, 4, 256>}, {pipeline_mode = #tpu.pipeline_mode<synchronous>, transform_indices = @transform_1, window_bounds = array<i64: 9, 8, 4>}, {pipeline_mode = #tpu.pipeline_mode<synchronous>, transform_indices = @transform_2, window_bounds = array<i64: 9, 1, 256>}, {pipeline_mode = #tpu.pipeline_mode<synchronous>, transform_indices = @transform_3, window_bounds = array<i64: 8, 1>}, {transform_indices = @transform_4, window_bounds = array<i64: 1>}, {transform_indices = @transform_5, window_bounds = array<i64: 1, 8, 256>}]} {
    %c0 = arith.constant 0 : index
    %c0_0 = arith.constant 0 : index
    %c0_1 = arith.constant 0 : index
    %0 = vector.load %arg1[%c0, %c0_0, %c0_1] : memref<1x4x256xf32, #tpu.memory_space<vmem>>, vector<1x4x256xf32>
    %1 = vector.shape_cast %0 : vector<1x4x256xf32> to vector<4x256xf32>
    %cst = arith.constant 0.000000e+00 : f32
    %2 = vector.broadcast %cst : f32 to vector<8x256xf32>
    %c17_i32 = arith.constant 17 : i32
    %3 = tpu.dynamic_rotate %1 by %c17_i32 dim 1 : vector<4x256xf32>, i32 -> vector<4x256xf32>
    %c0_2 = arith.constant 0 : index
    %c0_3 = arith.constant 0 : index
    %c0_4 = arith.constant 0 : index
    %4 = vector.load %arg3[%c0_2, %c0_3, %c0_4] : memref<9x1x256xf32, #tpu.memory_space<vmem>>, vector<1x1x256xf32>
    %5 = vector.shape_cast %4 : vector<1x1x256xf32> to vector<1x256xf32>
    %6 = vector.broadcast %5 : vector<1x256xf32> to vector<4x256xf32>
    %7 = arith.mulf %3, %6 : vector<4x256xf32>
    %c0_5 = arith.constant 0 : index
    %c0_6 = arith.constant 0 : index
    %c0_7 = arith.constant 0 : index
    %8 = vector.load %arg2[%c0_5, %c0_6, %c0_7] : memref<9x8x4xf32, #tpu.memory_space<vmem>>, vector<1x8x4xf32>
    %9 = vector.shape_cast %8 : vector<1x8x4xf32> to vector<8x4xf32>
    %cst_8 = arith.constant dense<0.000000e+00> : vector<8x256xf32>
    %10 = tpu.matmul %9, %7, %cst_8 {dimension_numbers = #tpu.dot_dimension_numbers<[1], [0], [0], [1], [0, 0, 1, 1], [], []>} : vector<8x4xf32>, vector<4x256xf32>, vector<8x256xf32> -> vector<8x256xf32>
    %11 = arith.addf %2, %10 : vector<8x256xf32>
    %c16_i32 = arith.constant 16 : i32
    %12 = tpu.dynamic_rotate %1 by %c16_i32 dim 1 : vector<4x256xf32>, i32 -> vector<4x256xf32>
    %c1 = arith.constant 1 : index
    %c0_9 = arith.constant 0 : index
    %c0_10 = arith.constant 0 : index
    %13 = vector.load %arg3[%c1, %c0_9, %c0_10] : memref<9x1x256xf32, #tpu.memory_space<vmem>>, vector<1x1x256xf32>
    %14 = vector.shape_cast %13 : vector<1x1x256xf32> to vector<1x256xf32>
    %15 = vector.broadcast %14 : vector<1x256xf32> to vector<4x256xf32>
    %16 = arith.mulf %12, %15 : vector<4x256xf32>
    %c1_11 = arith.constant 1 : index
    %c0_12 = arith.constant 0 : index
    %c0_13 = arith.constant 0 : index
    %17 = vector.load %arg2[%c1_11, %c0_12, %c0_13] : memref<9x8x4xf32, #tpu.memory_space<vmem>>, vector<1x8x4xf32>
    %18 = vector.shape_cast %17 : vector<1x8x4xf32> to vector<8x4xf32>
    %cst_14 = arith.constant dense<0.000000e+00> : vector<8x256xf32>
    %19 = tpu.matmul %18, %16, %cst_14 {dimension_numbers = #tpu.dot_dimension_numbers<[1], [0], [0], [1], [0, 0, 1, 1], [], []>} : vector<8x4xf32>, vector<4x256xf32>, vector<8x256xf32> -> vector<8x256xf32>
    %20 = arith.addf %11, %19 : vector<8x256xf32>
    %c15_i32 = arith.constant 15 : i32
    %21 = tpu.dynamic_rotate %1 by %c15_i32 dim 1 : vector<4x256xf32>, i32 -> vector<4x256xf32>
    %c2 = arith.constant 2 : index
    %c0_15 = arith.constant 0 : index
    %c0_16 = arith.constant 0 : index
    %22 = vector.load %arg3[%c2, %c0_15, %c0_16] : memref<9x1x256xf32, #tpu.memory_space<vmem>>, vector<1x1x256xf32>
    %23 = vector.shape_cast %22 : vector<1x1x256xf32> to vector<1x256xf32>
    %24 = vector.broadcast %23 : vector<1x256xf32> to vector<4x256xf32>
    %25 = arith.mulf %21, %24 : vector<4x256xf32>
    %c2_17 = arith.constant 2 : index
    %c0_18 = arith.constant 0 : index
    %c0_19 = arith.constant 0 : index
    %26 = vector.load %arg2[%c2_17, %c0_18, %c0_19] : memref<9x8x4xf32, #tpu.memory_space<vmem>>, vector<1x8x4xf32>
    %27 = vector.shape_cast %26 : vector<1x8x4xf32> to vector<8x4xf32>
    %cst_20 = arith.constant dense<0.000000e+00> : vector<8x256xf32>
    %28 = tpu.matmul %27, %25, %cst_20 {dimension_numbers = #tpu.dot_dimension_numbers<[1], [0], [0], [1], [0, 0, 1, 1], [], []>} : vector<8x4xf32>, vector<4x256xf32>, vector<8x256xf32> -> vector<8x256xf32>
    %29 = arith.addf %20, %28 : vector<8x256xf32>
    %c1_i32 = arith.constant 1 : i32
    %30 = tpu.dynamic_rotate %1 by %c1_i32 dim 1 : vector<4x256xf32>, i32 -> vector<4x256xf32>
    %c3 = arith.constant 3 : index
    %c0_21 = arith.constant 0 : index
    %c0_22 = arith.constant 0 : index
    %31 = vector.load %arg3[%c3, %c0_21, %c0_22] : memref<9x1x256xf32, #tpu.memory_space<vmem>>, vector<1x1x256xf32>
    %32 = vector.shape_cast %31 : vector<1x1x256xf32> to vector<1x256xf32>
    %33 = vector.broadcast %32 : vector<1x256xf32> to vector<4x256xf32>
    %34 = arith.mulf %30, %33 : vector<4x256xf32>
    %c3_23 = arith.constant 3 : index
    %c0_24 = arith.constant 0 : index
    %c0_25 = arith.constant 0 : index
    %35 = vector.load %arg2[%c3_23, %c0_24, %c0_25] : memref<9x8x4xf32, #tpu.memory_space<vmem>>, vector<1x8x4xf32>
    %36 = vector.shape_cast %35 : vector<1x8x4xf32> to vector<8x4xf32>
    %cst_26 = arith.constant dense<0.000000e+00> : vector<8x256xf32>
    %37 = tpu.matmul %36, %34, %cst_26 {dimension_numbers = #tpu.dot_dimension_numbers<[1], [0], [0], [1], [0, 0, 1, 1], [], []>} : vector<8x4xf32>, vector<4x256xf32>, vector<8x256xf32> -> vector<8x256xf32>
    %38 = arith.addf %29, %37 : vector<8x256xf32>
    %c4 = arith.constant 4 : index
    %c0_27 = arith.constant 0 : index
    %c0_28 = arith.constant 0 : index
    %39 = vector.load %arg2[%c4, %c0_27, %c0_28] : memref<9x8x4xf32, #tpu.memory_space<vmem>>, vector<1x8x4xf32>
    %40 = vector.shape_cast %39 : vector<1x8x4xf32> to vector<8x4xf32>
    %cst_29 = arith.constant dense<0.000000e+00> : vector<8x256xf32>
    %41 = tpu.matmul %40, %1, %cst_29 {dimension_numbers = #tpu.dot_dimension_numbers<[1], [0], [0], [1], [0, 0, 1, 1], [], []>} : vector<8x4xf32>, vector<4x256xf32>, vector<8x256xf32> -> vector<8x256xf32>
    %42 = arith.addf %38, %41 : vector<8x256xf32>
    %c255_i32 = arith.constant 255 : i32
    %43 = tpu.dynamic_rotate %1 by %c255_i32 dim 1 : vector<4x256xf32>, i32 -> vector<4x256xf32>
    %c5 = arith.constant 5 : index
    %c0_30 = arith.constant 0 : index
    %c0_31 = arith.constant 0 : index
    %44 = vector.load %arg3[%c5, %c0_30, %c0_31] : memref<9x1x256xf32, #tpu.memory_space<vmem>>, vector<1x1x256xf32>
    %45 = vector.shape_cast %44 : vector<1x1x256xf32> to vector<1x256xf32>
    %46 = vector.broadcast %45 : vector<1x256xf32> to vector<4x256xf32>
    %47 = arith.mulf %43, %46 : vector<4x256xf32>
    %c5_32 = arith.constant 5 : index
    %c0_33 = arith.constant 0 : index
    %c0_34 = arith.constant 0 : index
    %48 = vector.load %arg2[%c5_32, %c0_33, %c0_34] : memref<9x8x4xf32, #tpu.memory_space<vmem>>, vector<1x8x4xf32>
    %49 = vector.shape_cast %48 : vector<1x8x4xf32> to vector<8x4xf32>
    %cst_35 = arith.constant dense<0.000000e+00> : vector<8x256xf32>
    %50 = tpu.matmul %49, %47, %cst_35 {dimension_numbers = #tpu.dot_dimension_numbers<[1], [0], [0], [1], [0, 0, 1, 1], [], []>} : vector<8x4xf32>, vector<4x256xf32>, vector<8x256xf32> -> vector<8x256xf32>
    %51 = arith.addf %42, %50 : vector<8x256xf32>
    %c241_i32 = arith.constant 241 : i32
    %52 = tpu.dynamic_rotate %1 by %c241_i32 dim 1 : vector<4x256xf32>, i32 -> vector<4x256xf32>
    %c6 = arith.constant 6 : index
    %c0_36 = arith.constant 0 : index
    %c0_37 = arith.constant 0 : index
    %53 = vector.load %arg3[%c6, %c0_36, %c0_37] : memref<9x1x256xf32, #tpu.memory_space<vmem>>, vector<1x1x256xf32>
    %54 = vector.shape_cast %53 : vector<1x1x256xf32> to vector<1x256xf32>
    %55 = vector.broadcast %54 : vector<1x256xf32> to vector<4x256xf32>
    %56 = arith.mulf %52, %55 : vector<4x256xf32>
    %c6_38 = arith.constant 6 : index
    %c0_39 = arith.constant 0 : index
    %c0_40 = arith.constant 0 : index
    %57 = vector.load %arg2[%c6_38, %c0_39, %c0_40] : memref<9x8x4xf32, #tpu.memory_space<vmem>>, vector<1x8x4xf32>
    %58 = vector.shape_cast %57 : vector<1x8x4xf32> to vector<8x4xf32>
    %cst_41 = arith.constant dense<0.000000e+00> : vector<8x256xf32>
    %59 = tpu.matmul %58, %56, %cst_41 {dimension_numbers = #tpu.dot_dimension_numbers<[1], [0], [0], [1], [0, 0, 1, 1], [], []>} : vector<8x4xf32>, vector<4x256xf32>, vector<8x256xf32> -> vector<8x256xf32>
    %60 = arith.addf %51, %59 : vector<8x256xf32>
    %c240_i32 = arith.constant 240 : i32
    %61 = tpu.dynamic_rotate %1 by %c240_i32 dim 1 : vector<4x256xf32>, i32 -> vector<4x256xf32>
    %c7 = arith.constant 7 : index
    %c0_42 = arith.constant 0 : index
    %c0_43 = arith.constant 0 : index
    %62 = vector.load %arg3[%c7, %c0_42, %c0_43] : memref<9x1x256xf32, #tpu.memory_space<vmem>>, vector<1x1x256xf32>
    %63 = vector.shape_cast %62 : vector<1x1x256xf32> to vector<1x256xf32>
    %64 = vector.broadcast %63 : vector<1x256xf32> to vector<4x256xf32>
    %65 = arith.mulf %61, %64 : vector<4x256xf32>
    %c7_44 = arith.constant 7 : index
    %c0_45 = arith.constant 0 : index
    %c0_46 = arith.constant 0 : index
    %66 = vector.load %arg2[%c7_44, %c0_45, %c0_46] : memref<9x8x4xf32, #tpu.memory_space<vmem>>, vector<1x8x4xf32>
    %67 = vector.shape_cast %66 : vector<1x8x4xf32> to vector<8x4xf32>
    %cst_47 = arith.constant dense<0.000000e+00> : vector<8x256xf32>
    %68 = tpu.matmul %67, %65, %cst_47 {dimension_numbers = #tpu.dot_dimension_numbers<[1], [0], [0], [1], [0, 0, 1, 1], [], []>} : vector<8x4xf32>, vector<4x256xf32>, vector<8x256xf32> -> vector<8x256xf32>
    %69 = arith.addf %60, %68 : vector<8x256xf32>
    %c239_i32 = arith.constant 239 : i32
    %70 = tpu.dynamic_rotate %1 by %c239_i32 dim 1 : vector<4x256xf32>, i32 -> vector<4x256xf32>
    %c8 = arith.constant 8 : index
    %c0_48 = arith.constant 0 : index
    %c0_49 = arith.constant 0 : index
    %71 = vector.load %arg3[%c8, %c0_48, %c0_49] : memref<9x1x256xf32, #tpu.memory_space<vmem>>, vector<1x1x256xf32>
    %72 = vector.shape_cast %71 : vector<1x1x256xf32> to vector<1x256xf32>
    %73 = vector.broadcast %72 : vector<1x256xf32> to vector<4x256xf32>
    %74 = arith.mulf %70, %73 : vector<4x256xf32>
    %c8_50 = arith.constant 8 : index
    %c0_51 = arith.constant 0 : index
    %c0_52 = arith.constant 0 : index
    %75 = vector.load %arg2[%c8_50, %c0_51, %c0_52] : memref<9x8x4xf32, #tpu.memory_space<vmem>>, vector<1x8x4xf32>
    %76 = vector.shape_cast %75 : vector<1x8x4xf32> to vector<8x4xf32>
    %cst_53 = arith.constant dense<0.000000e+00> : vector<8x256xf32>
    %77 = tpu.matmul %76, %74, %cst_53 {dimension_numbers = #tpu.dot_dimension_numbers<[1], [0], [0], [1], [0, 0, 1, 1], [], []>} : vector<8x4xf32>, vector<4x256xf32>, vector<8x256xf32> -> vector<8x256xf32>
    %78 = arith.addf %69, %77 : vector<8x256xf32>
    %c0_54 = arith.constant 0 : index
    %c0_55 = arith.constant 0 : index
    %79 = vector.load %arg4[%c0_54, %c0_55] : memref<8x1xf32, #tpu.memory_space<vmem>>, vector<8x1xf32>
    %80 = vector.broadcast %79 : vector<8x1xf32> to vector<8x256xf32>
    %81 = arith.addf %78, %80 : vector<8x256xf32>
    %c0_56 = arith.constant 0 : index
    %82 = memref.load %arg5[%c0_56] : memref<1xf32, #tpu.memory_space<smem>>
    %cst_57 = arith.constant 0.000000e+00 : f32
    %83 = vector.broadcast %cst_57 : f32 to vector<8x256xf32>
    %84 = arith.cmpf oge, %81, %83 : vector<8x256xf32>
    %85 = vector.broadcast %82 : f32 to vector<8x256xf32>
    %86 = arith.mulf %85, %81 : vector<8x256xf32>
    %87 = arith.select %84, %81, %86 : vector<8x256xi1>, vector<8x256xf32>
    %c0_58 = arith.constant 0 : index
    %c0_59 = arith.constant 0 : index
    %c0_60 = arith.constant 0 : index
    %88 = vector.load %arg6[%c0_58, %c0_59, %c0_60] : memref<1x8x256xf32, #tpu.memory_space<vmem>>, vector<1x8x256xf32>
    %89 = vector.shape_cast %88 : vector<1x8x256xf32> to vector<8x256xf32>
    %90 = vector.shape_cast %87 : vector<8x256xf32> to vector<1x8x256xf32>
    tpu.vector_store %arg6[%c0_58, %c0_59, %c0_60], %90 {strides = array<i32>} : memref<1x8x256xf32, #tpu.memory_space<vmem>>, vector<1x8x256xf32>,
    return
  }
  func.func @transform_0(%arg0: i32) -> (i32, i32, i32) {
    %c0_i32 = arith.constant 0 : i32
    %c0_i32_0 = arith.constant 0 : i32
    %c0_i32_1 = arith.constant 0 : i32
    return %arg0, %c0_i32, %c0_i32_0 : i32, i32, i32
  }
  func.func @transform_1(%arg0: i32) -> (i32, i32, i32) {
    %c0_i32 = arith.constant 0 : i32
    %c0_i32_0 = arith.constant 0 : i32
    %c0_i32_1 = arith.constant 0 : i32
    %c0_i32_2 = arith.constant 0 : i32
    return %c0_i32, %c0_i32_0, %c0_i32_1 : i32, i32, i32
  }
  func.func @transform_2(%arg0: i32) -> (i32, i32, i32) {
    %c0_i32 = arith.constant 0 : i32
    %c0_i32_0 = arith.constant 0 : i32
    %c0_i32_1 = arith.constant 0 : i32
    %c0_i32_2 = arith.constant 0 : i32
    return %c0_i32, %c0_i32_0, %c0_i32_1 : i32, i32, i32
  }
  func.func @transform_3(%arg0: i32) -> (i32, i32) {
    %c0_i32 = arith.constant 0 : i32
    %c0_i32_0 = arith.constant 0 : i32
    %c0_i32_1 = arith.constant 0 : i32
    return %c0_i32, %c0_i32_0 : i32, i32
  }
  func.func @transform_4(%arg0: i32) -> i32 {
    %c0_i32 = arith.constant 0 : i32
    %c0_i32_0 = arith.constant 0 : i32
    return %c0_i32 : i32
  }
  func.func @transform_5(%arg0: i32) -> (i32, i32, i32) {
    %c0_i32 = arith.constant 0 : i32
    %c0_i32_0 = arith.constant 0 : i32
    %c0_i32_1 = arith.constant 0 : i32
    return %arg0, %c0_i32, %c0_i32_0 : i32, i32, i32
  }
}

</mosaic_0001>

<bundles_post_ra>
// kernel: conv_block_forward.1
= control target key start
LH: loop header
LB: loop body
LE: loop exit
PB: predicated region body
PF: predicated region fallthrough
CT: control target
= control target key end

     0   :  { %s1357_s20 = smov 0   ;;  %s1534_s0 = inlined_call_operand.vmem [shape: f32[2,4,256], index: 0, kind: input, shape index: {}]   ;;  %s1535_s1 = inlined_call_operand.vmem [shape: f32[9,8,4], index: 1, kind: input, shape index: {}]   ;;  %s1536_s2 = inlined_call_operand.vmem [shape: f32[9,1,256], index: 2, kind: input, shape index: {}]   ;;  %s1537_s3 = inlined_call_operand.vmem [shape: f32[8,1], index: 3, kind: input, shape index: {}]   ;;  %s1538_s4 = inlined_call_operand.<no memory space> [shape: f32[1], index: 4, kind: input, shape index: {}]   ;;  %s1539_s5 = inlined_call_operand.vmem [shape: f32[2,8,256], index: 5, kind: output, shape index: {}]  }
   0x1   :  { %10 = sst [smem:[#allocation2]] %s1538_s4 }
   0x2 LB: > { %s1231_s21 = sadd.s32 4294967295, %s1312_s20   ;;  %p1235_p0 = scmp.ge.s32.totalorder %s1312_s20, 1  ;;  %s1312_s20 = sphi %s1357_s20, %s16_s20  }
   0x3   : > { %p188_p1 = scmp.lt.s32.totalorder %s1312_s20, 3 }
   0x5   : > { %p189_p2 = pnand %p1235_p0, %p188_p1 }
   0x6   : > { %p216_p3 = scmp.lt.s32.totalorder (!%p189_p2), %s1231_s21, 1  ;;  %s1315_s25 = smov (!%p189_p2), 17  }
   0x7   : > { %192 = sbr.rel (%p189_p2) target bundleno = 367 (0x16f), region = 40  ;;  %s1316_s26 = smov (!%p189_p2), 16  }
   0x8   : > { %s1317_s27 = smov (!%p189_p2), 15   ;;  %s1318_s28 = smov (!%p189_p2), 1  }
   0x9   : > { %s1319_s29 = smov (!%p189_p2), 127   ;;  %s1320_s30 = smov (!%p189_p2), 113  }
   0xa   : > { %s1322_s6 = smov (!%p189_p2), 112   ;;  %s1323_s7 = smov (!%p189_p2), 111  }
   0xc   : > { %s1541_s21 = smov (!%p216_p3, %s1231_s21), 1  ;;  %v1314_v1 = vmov 0.0   ;;  %v1321_v3 = vmov 0   ;;  %v1158_v4 = vld [vmem:[%s1537_s3] sm:$0xff]  ;;  %v234_v5 = vlaneseq  ;;  %vm282_vm1 = vcmask 1043456   ;;  %v1241_v40 = vld [vmem:[%s1535_s1 + $0x8] sm:$0xff] }
   0xd   : > { %s1284_s4 = sshll.u32 %s1541_s21, 3  ;;  %353 = vmatprep.mubr.f32.mxu0 %v1314_v1  ;;  %433 = vmatprep.mubr.f32.mxu1 %v1314_v1  ;;  %v239_v10 = vld [vmem:[%s1536_s2] sm:$0x3]  ;;  %v1240_v15 = vld [vmem:[%s1536_s2 + $0x2] sm:$0x3]  ;;  %vm278_vm5 = vcmask 31744  }
   0xe   : > { %s220_s24 = scalar_lea.vmem %s1534_s0, %s1284_s4  ;;  %1304 = vset.pattern.permute.xlu0 %v1321_v3  ;;  %v242_v6 = vshrl.u32 %v234_v5, 7  ;;  %v1398_v7 = vand.u32 127, %v234_v5  ;;  %v1248_v20 = vld [vmem:[%s1536_s2 + $0x4] sm:$0x3]  ;;  %v1253_v25 = vld [vmem:[%s1536_s2 + $0x6] sm:$0x3] }
   0xf   : > { %v1371_v0 = vld [vmem:[%s220_s24] sm:$0xff]  ;;  %v1262_v39 = vld [vmem:[%s1536_s2 + $0xa] sm:$0x3]  ;;  %v1267_v51 = vld [vmem:[%s1536_s2 + $0xc] sm:$0x3]  ;;  %s1166_s4 = sld [smem:[#allocation2]] }
  0x10   : > { %230 = vrot.lane.b32.xlu1 %v1371_v0, %s1315_s25  ;;  %254 = vrot.lane.b32.xlu0 %v1371_v0, %s1316_s26  ;;  %v1378_v2 = vcombine.high %v1371_v0, %v1371_v0  ;;  %v1400_v8 = vsub.s32 0, %v242_v6  ;;  %v1402_v9 = vsub.s32 1, %v242_v6  ;;  %vm236_vm0 = vcmp.lt.s32.totalorder %v1398_v7, 17  ;;  %v253_v26 = vld [vmem:[%s1535_s1] sm:$0xff]  ;;  %v1249_v52 = vld [vmem:[%s1535_s1 + $0x10] sm:$0xff]  ;;  %s1285_s22 = sshll.u32 %s1541_s21, 4 }
  0x11   : > { %vm444_vm2 = vcmp.lt.s32.totalorder %v1398_v7, 15  ;;  %vm258_vm3 = vcmp.lt.s32.totalorder %v1398_v7, 16  ;;  %vm550_vm4 = vcmp.lt.s32.totalorder %v1398_v7, 1  ;;  %vm738_vm6 = vcmp.lt.s32.totalorder %v1398_v7, 127  ;;  %v1254_v53 = vld [vmem:[%s1535_s1 + $0x18] sm:$0xff]  ;;  %v1258_v63 = vld [vmem:[%s1535_s1 + $0x20] sm:$0xff] }
  0x12   : > { %v244_v13 = vrot.slane %v239_v10, %v1400_v8  ;;  %v248_v14 = vrot.slane %v239_v10, %v1402_v9  ;;  %v267_v23 = vrot.slane %v1240_v15, %v1400_v8  ;;  %v271_v24 = vrot.slane %v1240_v15, %v1402_v9  ;;  %v1272_v62 = vld [vmem:[%s1536_s2 + $0xe] sm:$0x3] }
  0x13   : > { %v453_v27 = vrot.slane %v1248_v20, %v1400_v8  ;;  %v457_v28 = vrot.slane %v1248_v20, %v1402_v9  ;;  %v559_v34 = vrot.slane %v1253_v25, %v1400_v8  ;;  %v563_v38 = vrot.slane %v1253_v25, %v1402_v9 }
  0x14   : > { %440 = vrot.lane.b32.xlu0 %v1371_v0, %s1317_s27  ;;  %232 = vrot.lane.b32.xlu1 %v1378_v2, %s1315_s25  ;;  %v747_v47 = vrot.slane %v1262_v39, %v1400_v8  ;;  %v751_v50 = vrot.slane %v1262_v39, %v1402_v9  ;;  %v853_v58 = vrot.slane %v1267_v51, %v1400_v8  ;;  %vm844_vm7 = vcmp.lt.s32.totalorder %v1398_v7, 113  ;;  %s225_s25 = scalar_lea.vmem %s1539_s5, %s1285_s22 }
  0x15   : > { %v857_v61 = vrot.slane %v1267_v51, %v1402_v9  ;;  %vm950_vm8 = vcmp.lt.s32.totalorder %v1398_v7, 112  ;;  %vm1056_vm9 = vcmp.lt.s32.totalorder %v1398_v7, 111 }
  0x18   : > { %442 = vrot.lane.b32.xlu1 %v1378_v2, %s1317_s27  ;;  %256 = vrot.lane.b32.xlu0 %v1378_v2, %s1316_s26 }
  0x1c   : > { %548 = vrot.lane.b32.xlu1 %v1378_v2, %s1318_s28  ;;  %546 = vrot.lane.b32.xlu0 %v1371_v0, %s1318_s28 }
  0x20   : > { %736 = vrot.lane.b32.xlu1 %v1378_v2, %s1319_s29  ;;  %734 = vrot.lane.b32.xlu0 %v1371_v0, %s1319_s29 }
  0x24   : > { %842 = vrot.lane.b32.xlu1 %v1378_v2, %s1320_s30  ;;  %840 = vrot.lane.b32.xlu0 %v1371_v0, %s1320_s30 }
  0x28   : > { %948 = vrot.lane.b32.xlu1 %v1378_v2, %s1322_s6  ;;  %946 = vrot.lane.b32.xlu0 %v1371_v0, %s1322_s6 }
  0x2c   : > { %1054 = vrot.lane.b32.xlu1 %v1378_v2, %s1323_s7  ;;  %1052 = vrot.lane.b32.xlu0 %v1371_v0, %s1323_s7 }
  0x30   : > { %1161 = vperm.xlu0 %1304, %v1158_v4  }
  0x82   : > { %v231_v11 = vpop.permute.xlu1 %230  ;;  %v255_v12 = vpop.permute.xlu0 %254 }
  0x86   : > { %v441_v16 = vpop.permute.xlu0 %440  ;;  %v233_v17 = vpop.permute.xlu1 %232 }
  0x87   : > { %v237_v18 = vsel %vm236_vm0, %v231_v11, %v233_v17  ;;  %v238_v19 = vsel %vm236_vm0, %v233_v17, %v231_v11 }
  0x88   : > { %v251_v21 = vmul.f32 %v244_v13, %v238_v19  ;;  %v252_v22 = vmul.f32 %v248_v14, %v237_v18  ;;  %v1277_v13 = vld [vmem:[%s1536_s2 + $0x10] sm:$0x3] }
  0x89   : > { %v1268_v14 = vld [vmem:[%s1535_s1 + $0x30] sm:$0xff] }
  0x8a   : > { %1245 = vmatprep.subr.msk.mxu1 %vm282_vm1, %v252_v22  ;;  %v443_v29 = vpop.permute.xlu1 %442  ;;  %v257_v30 = vpop.permute.xlu0 %256  ;;  %v1069_v22 = vrot.slane %v1277_v13, %v1402_v9 }
  0x8b   : > { %v445_v31 = vsel %vm444_vm2, %v441_v16, %v443_v29  ;;  %v259_v32 = vsel %vm258_vm3, %v255_v12, %v257_v30  ;;  %v260_v33 = vsel %vm258_vm3, %v257_v30, %v255_v12  ;;  %1246 = vmatpush1.msk.msra.mxu1 %vm282_vm1, %v251_v21  ;;  %v446_v35 = vsel %vm444_vm2, %v443_v29, %v441_v16 }
  0x8c   : > { %v274_v36 = vmul.f32 %v267_v23, %v260_v33  ;;  %v275_v37 = vmul.f32 %v271_v24, %v259_v32  ;;  %1247 = vmatmul.mubr.msk.f32.vlgmr.msra.gmra.mxu1 %vm278_vm5, %v253_v26  ;;  %v461_v41 = vmul.f32 %v457_v28, %v445_v31  ;;  %v460_v44 = vmul.f32 %v453_v27, %v446_v35  ;;  %v1273_v23 = vld [vmem:[%s1535_s1 + $0x38] sm:$0xff] }
  0x8d   : > { %643 = vmatprep.mubr.f32.mxu1 %v1314_v1  ;;  %v963_v12 = vrot.slane %v1272_v62, %v1402_v9  ;;  %v1065_v21 = vrot.slane %v1277_v13, %v1400_v8  ;;  %v1278_v9 = vld [vmem:[%s1535_s1 + $0x40] sm:$0xff] }
  0x8e   : > { %v549_v42 = vpop.permute.xlu1 %548  ;;  %1242 = vmatprep.subr.msk.mxu0 %vm282_vm1, %v275_v37  ;;  %v547_v43 = vpop.permute.xlu0 %546 }
  0x8f   : > { %v551_v45 = vsel %vm550_vm4, %v547_v43, %v549_v42  ;;  %v552_v46 = vsel %vm550_vm4, %v549_v42, %v547_v43  ;;  %1243 = vmatpush1.msk.msra.mxu0 %vm282_vm1, %v274_v36 }
  0x90   : > { %v566_v48 = vmul.f32 %v559_v34, %v552_v46  ;;  %v567_v49 = vmul.f32 %v563_v38, %v551_v45  ;;  %1250 = vmatprep.subr.msk.mxu0 %vm282_vm1, %v461_v41  ;;  %1244 = vmatmul.mubr.msk.f32.vlgmr.msra.gmra.mxu0 %vm278_vm5, %v1241_v40 }
  0x91   : > { %1251 = vmatpush1.msk.msra.mxu0 %vm282_vm1, %v460_v44  ;;  %537 = vmatprep.mubr.f32.mxu0 %v1314_v1 }
  0x92   : > { %v737_v54 = vpop.permute.xlu1 %736  ;;  %1255 = vmatprep.subr.msk.mxu1 %vm282_vm1, %v567_v49  ;;  %v735_v55 = vpop.permute.xlu0 %734  ;;  %1259 = vmatprep.subr.msk.mxu0 %vm282_vm1, %v1378_v2  ;;  %v1263_v2 = vld [vmem:[%s1535_s1 + $0x28] sm:$0xff] }
  0x93   : > { %v739_v56 = vsel %vm738_vm6, %v735_v55, %v737_v54  ;;  %v740_v57 = vsel %vm738_vm6, %v737_v54, %v735_v55  ;;  %1256 = vmatpush1.msk.msra.mxu1 %vm282_vm1, %v566_v48 }
  0x94   : > { %v754_v59 = vmul.f32 %v747_v47, %v739_v56  ;;  %v755_v60 = vmul.f32 %v751_v50, %v740_v57  ;;  %1252 = vmatmul.mubr.msk.f32.vlgmr.msra.gmra.mxu0 %vm278_vm5, %v1249_v52  ;;  %1257 = vmatmul.mubr.msk.f32.vlgmr.msra.gmra.mxu1 %vm278_vm5, %v1254_v53 }
  0x95   : > { %1260 = vmatpush1.msk.msra.mxu0 %vm282_vm1, %v1371_v0  ;;  %725 = vmatprep.mubr.f32.mxu0 %v1314_v1  ;;  %v959_v0 = vrot.slane %v1272_v62, %v1400_v8 }
  0x96   : > { %v843_v3 = vpop.permute.xlu1 %842  ;;  %1264 = vmatprep.subr.msk.mxu1 %vm282_vm1, %v755_v60  ;;  %v841_v4 = vpop.permute.xlu0 %840  ;;  %831 = vmatprep.mubr.f32.mxu1 %v1314_v1 }
  0x97   : > { %v845_v5 = vsel %vm844_vm7, %v841_v4, %v843_v3  ;;  %v846_v6 = vsel %vm844_vm7, %v843_v3, %v841_v4  ;;  %1265 = vmatpush1.msk.msra.mxu1 %vm282_vm1, %v754_v59 }
  0x98   : > { %v860_v10 = vmul.f32 %v853_v58, %v845_v5  ;;  %v861_v11 = vmul.f32 %v857_v61, %v846_v6  ;;  %1261 = vmatmul.mubr.msk.f32.vlgmr.msra.gmra.mxu0 %vm278_vm5, %v1258_v63  ;;  %1266 = vmatmul.mubr.msk.f32.vlgmr.msra.gmra.mxu1 %vm278_vm5, %v1263_v2  ;;  %v1169_v61 = vstv %s1166_s4 }
  0x99   : > { %937 = vmatprep.mubr.f32.mxu0 %v1314_v1  ;;  %1043 = vmatprep.mubr.f32.mxu1 %v1314_v1 }
  0x9a   : > { %v949_v15 = vpop.permute.xlu1 %948  ;;  %1269 = vmatprep.subr.msk.mxu0 %vm282_vm1, %v861_v11  ;;  %v947_v16 = vpop.permute.xlu0 %946 }
  0x9b   : > { %v951_v17 = vsel %vm950_vm8, %v947_v16, %v949_v15  ;;  %v952_v18 = vsel %vm950_vm8, %v949_v15, %v947_v16  ;;  %1270 = vmatpush1.msk.msra.mxu0 %vm282_vm1, %v860_v10 }
  0x9c   : > { %v966_v19 = vmul.f32 %v959_v0, %v951_v17  ;;  %v967_v20 = vmul.f32 %v963_v12, %v952_v18  ;;  %1271 = vmatmul.mubr.msk.f32.vlgmr.msra.gmra.mxu0 %vm278_vm5, %v1268_v14 }
  0x9d   : > { %1149 = vmatprep.mubr.f32.mxu0 %v1314_v1 }
  0x9e   : > { %v1055_v24 = vpop.permute.xlu1 %1054  ;;  %1274 = vmatprep.subr.msk.mxu1 %vm282_vm1, %v967_v20  ;;  %v1053_v25 = vpop.permute.xlu0 %1052 }
  0x9f   : > { %v1057_v26 = vsel %vm1056_vm9, %v1053_v25, %v1055_v24  ;;  %v1058_v7 = vsel %vm1056_vm9, %v1055_v24, %v1053_v25  ;;  %1275 = vmatpush1.msk.msra.mxu1 %vm282_vm1, %v966_v19 }
  0xa0   : > { %v1072_v27 = vmul.f32 %v1065_v21, %v1057_v26  ;;  %v1073_v8 = vmul.f32 %v1069_v22, %v1058_v7  ;;  %1276 = vmatmul.mubr.msk.f32.vlgmr.msra.gmra.mxu1 %vm278_vm5, %v1273_v23 }
  0xa2   : > { %1279 = vmatprep.subr.msk.mxu0 %vm282_vm1, %v1073_v8 }
  0xa3   : > { %1280 = vmatpush1.msk.msra.mxu0 %vm282_vm1, %v1072_v27 }
  0xa4   : > { %1281 = vmatmul.mubr.msk.f32.vlgmr.msra.gmra.mxu0 %vm278_vm5, %v1278_v9 }
  0xab   : > { %v1162_v57 = vpop.permute.xlu0 %1161 }
 0x14c   : > { %v435_v1 = vpop.f32.mrf.mxu1 }
 0x14e   : > { %v437_v29 = vpop.f32.mrf.mxu1 }
 0x150   : > { %v355_v28 = vpop.f32.mrf.mxu0 }
 0x151   : > { %v436_v30 = vadd.f32 %v435_v1, %v355_v28 }
 0x152   : > { %v357_v31 = vpop.f32.mrf.mxu0 }
 0x153   : > { %v438_v32 = vadd.f32 %v437_v29, %v357_v31 }
 0x154   : > { %v539_v33 = vpop.f32.mrf.mxu0  ;;  %v645_v34 = vpop.f32.mrf.mxu1 }
 0x155   : > { %v544_v35 = vadd.f32 %v539_v33, %v436_v30 }
 0x156   : > { %v541_v36 = vpop.f32.mrf.mxu0  ;;  %v647_v37 = vpop.f32.mrf.mxu1 }
 0x157   : > { %v545_v38 = vadd.f32 %v541_v36, %v438_v32  ;;  %v650_v39 = vadd.f32 %v645_v34, %v544_v35 }
 0x158   : > { %v727_v40 = vpop.f32.mrf.mxu0  ;;  %v833_v41 = vpop.f32.mrf.mxu1 }
 0x159   : > { %v651_v42 = vadd.f32 %v647_v37, %v545_v38  ;;  %v732_v43 = vadd.f32 %v727_v40, %v650_v39 }
 0x15a   : > { %v729_v44 = vpop.f32.mrf.mxu0  ;;  %v835_v47 = vpop.f32.mrf.mxu1 }
 0x15b   : > { %v733_v45 = vadd.f32 %v729_v44, %v651_v42  ;;  %v838_v46 = vadd.f32 %v833_v41, %v732_v43 }
 0x15c   : > { %v939_v48 = vpop.f32.mrf.mxu0 }
 0x15d   : > { %v839_v49 = vadd.f32 %v835_v47, %v733_v45  ;;  %v944_v50 = vadd.f32 %v939_v48, %v838_v46 }
 0x15e   : > { %v941_v51 = vpop.f32.mrf.mxu0 }
 0x15f   : > { %v945_v54 = vadd.f32 %v941_v51, %v839_v49 }
 0x160   : > { %v1045_v52 = vpop.f32.mrf.mxu1 }
 0x161   : > { %v1050_v55 = vadd.f32 %v1045_v52, %v944_v50 }
 0x162   : > { %v1047_v53 = vpop.f32.mrf.mxu1 }
 0x163   : > { %v1051_v58 = vadd.f32 %v1047_v53, %v945_v54 }
 0x164   : > { %v1151_v56 = vpop.f32.mrf.mxu0 }
 0x165   : > { %v1156_v59 = vadd.f32 %v1151_v56, %v1050_v55 }
 0x166   : > { %v1153_v60 = vpop.f32.mrf.mxu0 }
 0x167   : > { %v1157_v62 = vadd.f32 %v1153_v60, %v1051_v58  ;;  %v1164_v63 = vadd.f32 %v1162_v57, %v1156_v59 }
 0x169   : > { %v1165_v2 = vadd.f32 %v1162_v57, %v1157_v62  ;;  %vm1167_vm10 = vcmp.ge.f32.partialorder %v1164_v63, 0.0  ;;  %v1170_v3 = vmul.f32 %v1169_v61, %v1164_v63 }
 0x16b   : > { %vm1168_vm11 = vcmp.ge.f32.partialorder %v1165_v2, 0.0  ;;  %v1171_v4 = vmul.f32 %v1169_v61, %v1165_v2  ;;  %v1172_v5 = vsel %vm1167_vm10, %v1164_v63, %v1170_v3 }
 0x16c   : > { %1174 = vst [vmem:[%s225_s25] sm:$0xff] %v1172_v5 }
 0x16d   : > { %v1173_v6 = vsel %vm1168_vm11, %v1165_v2, %v1171_v4 }
 0x16e   : > { %1175 = vst [vmem:[%s225_s25 + $0x8] sm:$0xff] %v1173_v6 }
 0x16f PF: > { %s16_s20 = sadd.s32 1, %s1312_s20  }
 0x170   : > { %p13_p4 = scmp.ge.s32.totalorder %s16_s20, 4  }
 0x172   :  { %15 = sbr.rel (!%p13_p4) target bundleno = 2 (0x2), region = 85 }

</bundles_post_ra>
